<compile_context>
chip_gen: v6e
topology: v6e:2x2x1
jax: 0.10.0
libtpu: 0.0.40
codegen_flags: <defaults>
</compile_context>

<pallas_src>
import numpy as np
import jax
import jax.numpy as jnp
from jax.experimental import pallas as pl
from jax.experimental.pallas import tpu as pltpu


# ----------------------------- VMEM budgeting ------------------------------ #

def _vmem_caps():
    """(tile_budget_bytes, vmem_limit_bytes) -- generation aware, conservative."""
    phys = 64 * 1024 * 1024                       # fallback: v7x per-core VMEM
    try:
        phys = int(pltpu.get_tpu_info().vmem_capacity_bytes)
    except Exception:
        pass
    # ~24 MiB of in/out tiles on v7x (64 MiB), ~28 MiB on v5e/v6e (128 MiB),
    # plus explicit headroom for weights/bias/Mosaic scratch in the hard limit.
    tile_budget = min(3 * phys // 8, 28 * 1024 * 1024)
    vmem_limit = min(phys - 8 * 1024 * 1024, tile_budget + 8 * 1024 * 1024)
    return tile_budget, vmem_limit


def _spatial_tile(S, cin, couts, out_itemsizes, tile_budget):
    """Largest lane-aligned spatial tile whose buffers fit the VMEM budget."""
    io_per_col = cin * 4 + sum(c * it for c, it in zip(couts, out_itemsizes))
    # double-buffered in/out tiles + single-buffered bf16 activation temp
    # (in-kernel cast) + f32 matmul accumulators.
    per_col = 2 * io_per_col + cin * 2 + sum(c * 4 for c in couts)
    # per-step constant buffers: bf16 weights + lane-padded (Cout,1) f32 bias,
    # both double-buffered.
    fixed = sum(c * cin * 2 + c * 128 * 4 for c in couts) * 2
    avail = max(tile_budget - fixed, per_col * 128)
    max_cols = avail // per_col
    if S <= max_cols:
        return S                                   # full extent (always legal)
    return max(128, (max_cols // 128) * 128)       # lane-aligned tile


# --------------------------- fused 1x1 conv kernel ------------------------- #

def _make_conv_kernel(n_heads):
    def kernel(x_ref, *refs):
        ws = refs[:n_heads]
        bs = refs[n_heads:2 * n_heads]
        outs = refs[2 * n_heads:]
        # In-kernel f32 -> bf16 cast (VPU) of the shared activation tile:
        # halves the input HBM traffic vs. converting in the wrapper.
        x = x_ref[...].astype(jnp.bfloat16)
        for w_ref, b_ref, o_ref in zip(ws, bs, outs):
            acc = jnp.dot(w_ref[...], x, preferred_element_type=jnp.float32)
            o_ref[...] = (acc + b_ref[...]).astype(o_ref.dtype)
    return kernel


def conv1x1_heads(x, heads, out_dtypes=None):
    """Fused 1x1 convs sharing input x (NCHW); one Pallas output per head.

    x:      (B, Cin, H, W) float32
    heads:  list of (w, b) with w: (Cout, Cin) bf16, b: (Cout, 1) f32
    Returns a tuple of (B, Cout_h, H, W) arrays (default dtype = x.dtype).
    """
    B, Cin, H, W = x.shape
    S = H * W
    n_heads = len(heads)
    couts = [int(w.shape[0]) for (w, _) in heads]
    if out_dtypes is None:
        out_dtypes = [x.dtype] * n_heads
    itemsizes = [np.dtype(d).itemsize for d in out_dtypes]

    xr = x.reshape(B, Cin, S)                      # contiguous reshape (free)

    tile_budget, vmem_limit = _vmem_caps()
    tile_s = _spatial_tile(S, Cin, couts, itemsizes, tile_budget)
    s_tiles = int(pl.cdiv(S, tile_s))

    # Never let the grid collapse to a single step (megacore on v7x):
    nc = 1
    if B * s_tiles < 2:
        if sum(couts) >= 256 and all(c % 16 == 0 for c in couts):
            nc = 2                                 # split every head's Cout in 2
        elif S >= 256:
            tile_s = ((S // 2 + 127) // 128) * 128
            s_tiles = int(pl.cdiv(S, tile_s))
    cchunks = [c // nc for c in couts]

    grid = (B, s_tiles, nc)

    in_specs = [pl.BlockSpec((None, Cin, tile_s), lambda bi, si, ci: (bi, 0, si))]
    in_specs += [pl.BlockSpec((cc, Cin), lambda bi, si, ci: (ci, 0)) for cc in cchunks]
    in_specs += [pl.BlockSpec((cc, 1), lambda bi, si, ci: (ci, 0)) for cc in cchunks]
    out_specs = [pl.BlockSpec((None, cc, tile_s), lambda bi, si, ci: (bi, ci, si))
                 for cc in cchunks]
    out_shape = tuple(jax.ShapeDtypeStruct((B, c, S), d)
                      for c, d in zip(couts, out_dtypes))

    flops = 2 * B * S * Cin * sum(couts)
    bytes_accessed = (B * S * Cin * 4
                      + sum(B * S * c * it for c, it in zip(couts, itemsizes))
                      + sum(c * Cin * 2 + c * 4 for c in couts))

    outs = pl.pallas_call(
        _make_conv_kernel(n_heads),
        out_shape=out_shape,
        grid_spec=pltpu.PrefetchScalarGridSpec(
            num_scalar_prefetch=0,
            grid=grid,
            in_specs=in_specs,
            out_specs=out_specs,
        ),
        compiler_params=pltpu.CompilerParams(
            dimension_semantics=("parallel", "parallel", "parallel"),
            vmem_limit_bytes=int(vmem_limit)),
        cost_estimate=pl.CostEstimate(flops=int(flops), transcendentals=0,
                                      bytes_accessed=int(bytes_accessed)),
    )(xr, *[w for (w, _) in heads], *[b for (_, b) in heads])

    return tuple(o.reshape(B, c, H, W) for o, c in zip(outs, couts))


# ----------------------- bilinear upsample (Pallas) ------------------------ #

def _bilinear_matrix(in_size, out_size):
    # Matches nn.Upsample(size=..., mode='bilinear', align_corners=False).
    scale = in_size / out_size
    dst = np.arange(out_size, dtype=np.float64)
    src = np.maximum((dst + 0.5) * scale - 0.5, 0.0)
    i0 = np.minimum(np.floor(src).astype(np.int64), in_size - 1)
    i1 = np.minimum(i0 + 1, in_size - 1)
    w1 = (src - i0).astype(np.float32)
    w0 = 1.0 - w1
    A = np.zeros((out_size, in_size), dtype=np.float32)
    A[np.arange(out_size), i0] += w0
    A[np.arange(out_size), i1] += w1
    return jnp.asarray(A)


def _upsample_kernel(x_ref, ah_ref, awt_ref, o_ref):
    # x: (cblk, h, w) f32; ah: (out_h, h); awt: (w, out_w); o: (cblk, out_h, out_w)
    for c in range(x_ref.shape[0]):                # static unroll (<= 8 channels)
        t = jnp.dot(ah_ref[...], x_ref[c], preferred_element_type=jnp.float32)
        o_ref[c] = jnp.dot(t, awt_ref[...],
                           preferred_element_type=jnp.float32).astype(o_ref.dtype)


def upsample_bilinear_pallas(x, out_h, out_w):
    """Separable bilinear resize of an NCHW map: Ah @ X @ Aw^T per channel block."""
    B, C, H, W = x.shape
    if (H, W) == (out_h, out_w):
        return x
    ah = _bilinear_matrix(H, out_h)                       # (out_h, H) f32
    awt = jnp.transpose(_bilinear_matrix(W, out_w))       # (W, out_w) f32
    cblk = 8 if C % 8 == 0 else C
    grid = (B, C // cblk)
    _, vmem_limit = _vmem_caps()
    flops = 2 * B * C * (out_h * H * W + out_h * W * out_w)
    bytes_accessed = B * C * (H * W + out_h * out_w) * 4 + (out_h * H + W * out_w) * 4
    return pl.pallas_call(
        _upsample_kernel,
        out_shape=jax.ShapeDtypeStruct((B, C, out_h, out_w), x.dtype),
        grid_spec=pltpu.PrefetchScalarGridSpec(
            num_scalar_prefetch=0,
            grid=grid,
            in_specs=[
                pl.BlockSpec((None, cblk, H, W), lambda bi, ci: (bi, ci, 0, 0)),
                pl.BlockSpec((out_h, H), lambda bi, ci: (0, 0)),
                pl.BlockSpec((W, out_w), lambda bi, ci: (0, 0)),
            ],
            out_specs=pl.BlockSpec((None, cblk, out_h, out_w),
                                   lambda bi, ci: (bi, ci, 0, 0)),
        ),
        compiler_params=pltpu.CompilerParams(
            dimension_semantics=("parallel", "parallel"),
            vmem_limit_bytes=int(vmem_limit)),
        cost_estimate=pl.CostEstimate(flops=int(flops), transcendentals=0,
                                      bytes_accessed=int(bytes_accessed)),
    )(x, ah, awt)


# ------------------------------- module port ------------------------------- #

class OutputDecoderPallas:
    """JAX/Pallas port of CCVPE output_decoder (deterministic synthetic init)."""

    _OUTS = {"volume": 1280, "c16": 320, "c32": 112, "c64": 40, "c128": 24, "c256": 16}

    def __init__(self, embed_dims=256, key=None):
        if key is None:
            key = jax.random.PRNGKey(0)
        self.embed_dims = embed_dims
        self.params = {}      # f32 reference weights: (Cout, Cin, 1, 1), (Cout,)
        self.kparams = {}     # pre-cast kernel weights: (Cout, Cin) bf16, (Cout, 1) f32
        bound = 1.0 / np.sqrt(embed_dims)          # PyTorch default Conv2d init
        for name, cout in self._OUTS.items():
            key, kw, kb = jax.random.split(key, 3)
            w = jax.random.uniform(kw, (cout, embed_dims, 1, 1), jnp.float32, -bound, bound)
            b = jax.random.uniform(kb, (cout,), jnp.float32, -bound, bound)
            self.params[name] = (w, b)
            self.kparams[name] = (w.reshape(cout, embed_dims).astype(jnp.bfloat16),
                                  b.reshape(cout, 1).astype(jnp.float32))

    def __call__(self, p128, p64, p32, p16, image):
        # Fused conv on p128 -> (c256 16ch, c128 24ch) as two Pallas outputs.
        # The 1x1 conv commutes exactly with the bilinear resize, so the huge
        # 256-channel upsampled map of the PyTorch graph never materializes.
        y256, r2 = conv1x1_heads(p128, [self.kparams["c256"], self.kparams["c128"]])
        r0 = upsample_bilinear_pallas(y256, 256, 256)

        (r4,) = conv1x1_heads(p64, [self.kparams["c64"]])
        (r10,) = conv1x1_heads(p32, [self.kparams["c32"]])

        # Fused conv on p16 -> (c16 320ch, volume 1280ch) as two Pallas outputs.
        # TODO(synk): pass out_dtypes=[p16.dtype, jnp.bfloat16] to halve the
        # volume head's store traffic if downstream tolerates bf16 logits.
        r15, rvolume = conv1x1_heads(p16, [self.kparams["c16"], self.kparams["volume"]])

        return (r0, r2, r4, r10, r15, rvolume, image)


# ----------------------------------- test ---------------------------------- #

def _ref_conv1x1(x, w, b):
    # f32 reference matching PyTorch nn.Conv2d(kernel_size=1).
    Cout, C = w.shape[0], w.shape[1]
    return jnp.einsum('bchw,oc->bohw', x, w.reshape(Cout, C)) + b[None, :, None, None]


def _ref_upsample(x, out_h, out_w):
    B, C, H, W = x.shape
    Ah = _bilinear_matrix(H, out_h)
    Aw = _bilinear_matrix(W, out_w)
    y = jnp.einsum('Hh,bchw->bcHw', Ah, x)
    return jnp.einsum('Ww,bchw->bchW', Aw, y)


if __name__ == "__main__":
    key = jax.random.PRNGKey(0)
    k1, k2, k3, k4, k5 = jax.random.split(key, 5)

    embed = 32  # small embed_dims for the synthetic test
    p128 = jax.random.normal(k1, (2, embed, 16, 16), jnp.float32)
    p64  = jax.random.normal(k2, (2, embed, 8, 8), jnp.float32)
    p32  = jax.random.normal(k3, (2, embed, 8, 8), jnp.float32)
    p16  = jax.random.normal(k4, (2, embed, 4, 4), jnp.float32)
    image = jax.random.normal(k5, (2, 3, 32, 32), jnp.float32)

    dec = OutputDecoderPallas(embed_dims=embed, key=jax.random.PRNGKey(42))
    outs = dec(p128, p64, p32, p16, image)
    outs = jax.block_until_ready(outs)
    r0, r2, r4, r10, r15, rvolume, img_out = outs

    # shape checks
    assert r0.shape == (2, 16, 256, 256)
    assert r2.shape == (2, 24, 16, 16)
    assert r4.shape == (2, 40, 8, 8)
    assert r10.shape == (2, 112, 8, 8)
    assert r15.shape == (2, 320, 4, 4)
    assert rvolume.shape == (2, 1280, 4, 4)
    assert img_out.shape == image.shape

    # numerical check against plain-JAX f32 reference (PyTorch op order:
    # upsample-then-conv for r0).  Tolerances account for the bf16 matmul
    # inputs (accumulation stays f32).
    ref_r0 = _ref_conv1x1(_ref_upsample(p128, 256, 256), *dec.params["c256"])
    ref_r2 = _ref_conv1x1(p128, *dec.params["c128"])
    ref_r4 = _ref_conv1x1(p64, *dec.params["c64"])
    ref_r10 = _ref_conv1x1(p32, *dec.params["c32"])
    ref_r15 = _ref_conv1x1(p16, *dec.params["c16"])
    ref_rv = _ref_conv1x1(p16, *dec.params["volume"])
    for got, want in [(r0, ref_r0), (r2, ref_r2), (r4, ref_r4),
                      (r10, ref_r10), (r15, ref_r15), (rvolume, ref_rv)]:
        np.testing.assert_allclose(np.asarray(got), np.asarray(want),
                                   rtol=2e-2, atol=2e-2)
    np.testing.assert_allclose(np.asarray(img_out), np.asarray(image))

    print("KERNEL_OK")
</pallas_src>

<mosaic_0001>
module attributes {stable_mosaic.version = 11 : i64} {
  func.func @kernel(%arg0: i32, %arg1: i32, %arg2: i32, %arg3: memref<1x32x256xf32, #tpu.memory_space<vmem>>, %arg4: memref<16x32xbf16, #tpu.memory_space<vmem>>, %arg5: memref<24x32xbf16, #tpu.memory_space<vmem>>, %arg6: memref<16x1xf32, #tpu.memory_space<vmem>>, %arg7: memref<24x1xf32, #tpu.memory_space<vmem>>, %arg8: memref<1x16x256xf32, #tpu.memory_space<vmem>>, %arg9: memref<1x24x256xf32, #tpu.memory_space<vmem>>) attributes {dimension_semantics = [#tpu.dimension_semantics<parallel>, #tpu.dimension_semantics<parallel>, #tpu.dimension_semantics<parallel>], iteration_bounds = array<i64: 2, 1, 1>, scalar_prefetch = 0 : i64, scratch_operands = 0 : i64, tpu.core_type = #tpu.core_type<tc>, window_params = [{transform_indices = @transform_0, window_bounds = array<i64: 1, 32, 256>}, {transform_indices = @transform_1, window_bounds = array<i64: 16, 32>}, {transform_indices = @transform_2, window_bounds = array<i64: 24, 32>}, {transform_indices = @transform_3, window_bounds = array<i64: 16, 1>}, {transform_indices = @transform_4, window_bounds = array<i64: 24, 1>}, {transform_indices = @transform_5, window_bounds = array<i64: 1, 16, 256>}, {transform_indices = @transform_6, window_bounds = array<i64: 1, 24, 256>}]} {
    %c0 = arith.constant 0 : index
    %c0_0 = arith.constant 0 : index
    %c0_1 = arith.constant 0 : index
    %0 = vector.load %arg3[%c0, %c0_0, %c0_1] : memref<1x32x256xf32, #tpu.memory_space<vmem>>, vector<1x32x256xf32>
    %1 = vector.shape_cast %0 : vector<1x32x256xf32> to vector<32x256xf32>
    %2 = arith.truncf %1 : vector<32x256xf32> to vector<32x256xbf16>
    %c0_2 = arith.constant 0 : index
    %c0_3 = arith.constant 0 : index
    %3 = vector.load %arg4[%c0_2, %c0_3] : memref<16x32xbf16, #tpu.memory_space<vmem>>, vector<16x32xbf16>
    %cst = arith.constant dense<0.000000e+00> : vector<16x256xf32>
    %4 = tpu.matmul %3, %2, %cst {dimension_numbers = #tpu.dot_dimension_numbers<[1], [0], [0], [1], [0, 0, 1, 1], [], []>} : vector<16x32xbf16>, vector<32x256xbf16>, vector<16x256xf32> -> vector<16x256xf32>
    %c0_4 = arith.constant 0 : index
    %c0_5 = arith.constant 0 : index
    %5 = vector.load %arg6[%c0_4, %c0_5] : memref<16x1xf32, #tpu.memory_space<vmem>>, vector<16x1xf32>
    %6 = vector.broadcast %5 : vector<16x1xf32> to vector<16x256xf32>
    %7 = arith.addf %4, %6 : vector<16x256xf32>
    %c0_6 = arith.constant 0 : index
    %c0_7 = arith.constant 0 : index
    %c0_8 = arith.constant 0 : index
    %8 = vector.load %arg8[%c0_6, %c0_7, %c0_8] : memref<1x16x256xf32, #tpu.memory_space<vmem>>, vector<1x16x256xf32>
    %9 = vector.shape_cast %8 : vector<1x16x256xf32> to vector<16x256xf32>
    %10 = vector.shape_cast %7 : vector<16x256xf32> to vector<1x16x256xf32>
    tpu.vector_store %arg8[%c0_6, %c0_7, %c0_8], %10 {strides = array<i32>} : memref<1x16x256xf32, #tpu.memory_space<vmem>>, vector<1x16x256xf32>,
    %c0_9 = arith.constant 0 : index
    %c0_10 = arith.constant 0 : index
    %11 = vector.load %arg5[%c0_9, %c0_10] : memref<24x32xbf16, #tpu.memory_space<vmem>>, vector<24x32xbf16>
    %cst_11 = arith.constant dense<0.000000e+00> : vector<24x256xf32>
    %12 = tpu.matmul %11, %2, %cst_11 {dimension_numbers = #tpu.dot_dimension_numbers<[1], [0], [0], [1], [0, 0, 1, 1], [], []>} : vector<24x32xbf16>, vector<32x256xbf16>, vector<24x256xf32> -> vector<24x256xf32>
    %c0_12 = arith.constant 0 : index
    %c0_13 = arith.constant 0 : index
    %13 = vector.load %arg7[%c0_12, %c0_13] : memref<24x1xf32, #tpu.memory_space<vmem>>, vector<24x1xf32>
    %14 = vector.broadcast %13 : vector<24x1xf32> to vector<24x256xf32>
    %15 = arith.addf %12, %14 : vector<24x256xf32>
    %c0_14 = arith.constant 0 : index
    %c0_15 = arith.constant 0 : index
    %c0_16 = arith.constant 0 : index
    %16 = vector.load %arg9[%c0_14, %c0_15, %c0_16] : memref<1x24x256xf32, #tpu.memory_space<vmem>>, vector<1x24x256xf32>
    %17 = vector.shape_cast %16 : vector<1x24x256xf32> to vector<24x256xf32>
    %18 = vector.shape_cast %15 : vector<24x256xf32> to vector<1x24x256xf32>
    tpu.vector_store %arg9[%c0_14, %c0_15, %c0_16], %18 {strides = array<i32>} : memref<1x24x256xf32, #tpu.memory_space<vmem>>, vector<1x24x256xf32>,
    return
  }
  func.func @transform_0(%arg0: i32, %arg1: i32, %arg2: i32) -> (i32, i32, i32) {
    %c0_i32 = arith.constant 0 : i32
    %c0_i32_0 = arith.constant 0 : i32
    return %arg0, %c0_i32, %arg1 : i32, i32, i32
  }
  func.func @transform_1(%arg0: i32, %arg1: i32, %arg2: i32) -> (i32, i32) {
    %c0_i32 = arith.constant 0 : i32
    %c0_i32_0 = arith.constant 0 : i32
    return %arg2, %c0_i32 : i32, i32
  }
  func.func @transform_2(%arg0: i32, %arg1: i32, %arg2: i32) -> (i32, i32) {
    %c0_i32 = arith.constant 0 : i32
    %c0_i32_0 = arith.constant 0 : i32
    return %arg2, %c0_i32 : i32, i32
  }
  func.func @transform_3(%arg0: i32, %arg1: i32, %arg2: i32) -> (i32, i32) {
    %c0_i32 = arith.constant 0 : i32
    %c0_i32_0 = arith.constant 0 : i32
    return %arg2, %c0_i32 : i32, i32
  }
  func.func @transform_4(%arg0: i32, %arg1: i32, %arg2: i32) -> (i32, i32) {
    %c0_i32 = arith.constant 0 : i32
    %c0_i32_0 = arith.constant 0 : i32
    return %arg2, %c0_i32 : i32, i32
  }
  func.func @transform_5(%arg0: i32, %arg1: i32, %arg2: i32) -> (i32, i32, i32) {
    %c0_i32 = arith.constant 0 : i32
    return %arg0, %arg2, %arg1 : i32, i32, i32
  }
  func.func @transform_6(%arg0: i32, %arg1: i32, %arg2: i32) -> (i32, i32, i32) {
    %c0_i32 = arith.constant 0 : i32
    return %arg0, %arg2, %arg1 : i32, i32, i32
  }
}

</mosaic_0001>

<bundles_post_ra>
// kernel: tpu_custom_call.1
= control target key start
LH: loop header
LB: loop body
LE: loop exit
PB: predicated region body
PF: predicated region fallthrough
CT: control target
= control target key end

     0   :  { %s1322_s0 = inlined_call_operand.hbm [shape: f32[2,32,256], index: 0, kind: input, shape index: {}]   ;;  %s1323_s1 = inlined_call_operand.vmem [shape: bf16[16,32], index: 1, kind: input, shape index: {}]   ;;  %s1324_s2 = inlined_call_operand.vmem [shape: bf16[24,32], index: 2, kind: input, shape index: {}]   ;;  %s1325_s3 = inlined_call_operand.vmem [shape: f32[16,1], index: 3, kind: input, shape index: {}]   ;;  %s1326_s4 = inlined_call_operand.vmem [shape: f32[24,1], index: 4, kind: input, shape index: {}]   ;;  %s1327_s5 = inlined_call_operand.hbm [shape: f32[2,16,256], index: 5, kind: output, shape index: {0}]   ;;  %s1328_s6 = inlined_call_operand.hbm [shape: f32[2,24,256], index: 6, kind: output, shape index: {1}]  }
   0x1   :  { %1329 = sst [smem:[#allocation11_spill]] %s1322_s0 }
   0x2   :  { %12 = vsyncpa [#allocation3], 0 }
   0x3   :  { %14 = vsyncpa [#allocation3 + $0x1], 0 }
   0x4   :  { %15 = vsyncpa [#allocation4], 0 }
   0x5   :  { %17 = vsyncpa [#allocation4 + $0x1], 0 }
   0x6   :  { %18 = vsyncpa [#allocation7], 0 }
   0x7   :  { %20 = vsyncpa [#allocation7 + $0x1], 0  ;;  %s1104_s21 = smov 0   ;;  %s1106_s22 = smov 0  }
   0x8   :  { %s1108_s23 = smov 0   ;;  %s1110_s24 = smov 0  }
   0x9   :  { %s1112_s25 = smov 0   ;;  %s1114_s26 = smov 0  }
   0xa LB: > { %s814_s27 = sadd.s32 4294967295, %s1059_s26   ;;  %s815_s28 = sadd.s32 4294967294, %s1059_s26   ;;  %s1059_s26 = sphi %s1114_s26, %s26_s26   ;;  %s1055_s25 = sphi %s1112_s25, %s1343_s25   ;;  %s1051_s24 = sphi %s1110_s24, %s1342_s24   ;;  %s1047_s23 = sphi %s1108_s23, %s1341_s23   ;;  %s1043_s22 = sphi %s1106_s22, %s1340_s22   ;;  %s1039_s21 = sphi %s1104_s21, %s1339_s21  }
   0xb   : > { %s45_s29 = sadd.s32 1, %s1055_s25  ;;  %s54_s30 = sadd.s32 1, %s1047_s23 }
   0xc   : > { %p47_p0 = scmp.ge.s32.totalorder %s45_s29, 2  ;;  %p61_p1 = scmp.ne.s32.totalorder %s1047_s23, %s1043_s22 }
   0xd   : > { %p62_p2 = scmp.eq.s32.totalorder %s1059_s26, 0  ;;  %p67_p3 = scmp.ne.s32.totalorder %s1043_s22, %s1039_s21 }
   0xe   : > { %s1345_s29 = smov (%p47_p0, %s45_s29), 0  ;;  %p68_p5 = scmp.eq.s32.totalorder %s814_s27, 0 }
   0xf   : > { %p1145_p4 = por %p62_p2, %p61_p1  ;;  %s49_s8 = ssub.s32 %s1055_s25, %s1345_s29 }
  0x10   : > { %p199_p6 = scmp.eq.s32.totalorder %s814_s27, 1  ;;  %p52_p7 = scmp.eq.s32.totalorder %s49_s8, 0 }
  0x11   : > { %p1151_p8 = por %p68_p5, %p67_p3  ;;  %p205_p10 = scmp.eq.s32.totalorder %s815_s28, 1 }
  0x12   : > { %p1155_p9 = por %p199_p6, %p61_p1  ;;  %p861_p13 = scmp.lt.s32.totalorder %s1059_s26, 2 }
  0x13   : > { %s1160_s11 = scalar_select %p52_p7, %s1047_s23, %s54_s30  }
  0x14   : > { %p1162_p11 = por %p205_p10, %p67_p3  ;;  %s291_s13 = sand.u32 1, %s1047_s23  }
  0x15   : > { %s822_s14 = sshll.u32 %s291_s13, 6  ;;  %s840_s15 = sshll.u32 %s1055_s25, 10 }
  0x16   : > { %s1334_s0 = sld [smem:[#allocation11_spill]]  ;;  %s295_s19 = scalar_lea.vmem [#allocation2], %s822_s14 }
  0x17   : > { %s304_s20 = sshll.u32 %s295_s19, 4  ;;  %p1175_p0 = pnand %p861_p13, %p1145_p4  ;;  %s305_s20 = int_to_ptr.vmem [resolvable:$true] %s304_s20 }
  0x18   : > { %p825_p1 = scmp.ge.s32.totalorder %s1059_s26, 1  ;;  %s292_s28 = scalar_lea.sflag [#allocation3], %s291_s13 }
  0x19   : > { %p923_p2 = pneg %p1175_p0  ;;  %s934_s30 = scalar_lea.vmem %s305_s20, 1024 }
  0x1a   : > { %p935_p3 = scmp.ne.s32.totalorder %s305_s20, %s934_s30  ;;  %s1061_s8 = smov [#allocation2]  }
  0x1b   : > { %s939_s16 = sshll.u32 %s1061_s8, 4  ;;  %s940_s16 = int_to_ptr.vmem [resolvable:$false] %s939_s16 }
  0x1c   : > { %s303_s18 = scalar_lea.hbm %s1334_s0, %s840_s15  ;;  %p937_p5 = pnand %p935_p3, %p923_p2 }
  0x1d   : > { %s941_s14 = scalar_lea.vmem %s940_s16, 2048  ;;  %p942_p7 = scmp.lt.s32.totalorder %s305_s20, %s940_s16 }
  0x1e   : > { %p938_p6 = pneg %p937_p5  ;;  %p943_p10 = scmp.lt.s32.totalorder %s941_s14, %s934_s30 }
  0x20   : > { %p944_p12 = por %p943_p10, %p942_p7 }
  0x22   : > { %p945_p4 = pnand %p944_p12, %p938_p6 }
  0x24   : > { %948 = shalt.err (!%p945_p4)
}
  0x25   : > { %s1062_s7 = smov 256   ;;  %s1063_s13 = smov 16  }
  0x26   : > { %853 = dma.hbm_to_vmem [thread:$0]  (!%p1175_p0), %s303_s18, 1024, %s305_s20, %s292_s28, %s1062_s7, %s1062_s7, %s1063_s13  }
  0x27   : > { %p312_p13 = scmp.lt.s32.totalorder %s1059_s26, 3 }
  0x29   : > { %p313_p2 = pnand %p825_p1, %p312_p13 }
  0x2a   : > { %s1188_s15 = sand.u32 (!%p313_p2), 1, %s1043_s22  }
  0x2b   : > { %316 = sbr.rel (%p313_p2) target bundleno = 299 (0x12b), region = 40  ;;  %s826_s17 = sshll.u32 (!%p313_p2), %s1188_s15, 6 }
  0x2c   : > { %s319_s19 = scalar_lea.sflag (!%p313_p2), [#allocation3], %s1188_s15  ;;  %s322_s30 = scalar_lea.vmem (!%p313_p2), [#allocation2], %s826_s17 }
  0x30   : > { %1026 = dma.done.wait (%p1151_p8), %s319_s19, 1024  }
  0x31   : > { %1028 = vsyncadd (%p1151_p8), %s319_s19, 4294966272  ;;  %v1064_v0 = vmov 0   ;;  %v411_v1 = vld [vmem:[%s322_s30 + $0x28] sm:$0xff]  ;;  %v413_v2 = vld [vmem:[%s322_s30 + $0x38] sm:$0xff]  ;;  %vm437_vm0 = vcmask 261120   ;;  %s842_s27 = smul.u32 48, %s1188_s15 }
  0x32   : > { %473 = vmatprep.mubr.bf16.mxu0 %v1064_v0  ;;  %555 = vmatprep.mubr.bf16.mxu1 %v1064_v0  ;;  %v410_v3 = vld [vmem:[%s322_s30 + $0x20] sm:$0xff]  ;;  %v417_v4 = vpack.c.bf16 %v413_v2, %v411_v1  ;;  %v412_v5 = vld [vmem:[%s322_s30 + $0x30] sm:$0xff]  ;;  %v407_v6 = vld [vmem:[%s322_s30 + $0x8] sm:$0xff]  ;;  %s827_s28 = sshll.u32 %s1188_s15, 5  ;;  %s841_s7 = sshll.u32 %s1051_s24, 9 }
  0x33   : > { %916 = vset.pattern.permute.xlu0 %v1064_v0  ;;  %917 = vset.pattern.permute.xlu1 %v1064_v0  ;;  %v409_v7 = vld [vmem:[%s322_s30 + $0x18] sm:$0xff]  ;;  %v416_v8 = vpack.c.bf16 %v412_v5, %v410_v3  ;;  %v406_v10 = vld [vmem:[%s322_s30] sm:$0xff]  ;;  %v408_v11 = vld [vmem:[%s322_s30 + $0x10] sm:$0xff]  ;;  %s368_s8 = scalar_lea.vmem [#allocation5], %s827_s28  ;;  %s1222_s14 = scalar_lea.vmem [#allocation6], %s842_s27 }
  0x34   : > { %v415_v9 = vpack.c.bf16 %v409_v7, %v407_v6  ;;  %453 = vmatprep.subr.bf16.mxu0 %v417_v4  ;;  %535 = vmatprep.subr.bf16.mxu1 %v417_v4  ;;  %v414_v12 = vpack.c.bf16 %v408_v11, %v406_v10  ;;  %v420_v13 = vld [vmem:[%s1325_s3] sm:$0xff]  ;;  %v421_v17 = vld [vmem:[%s1325_s3 + $0x8] sm:$0xff]  ;;  %v493_v19 = vld [vmem:[%s1326_s4 + $0x10] sm:$0xff]  ;;  %s604_s16 = sshll.u32 %s368_s8, 4  ;;  %s625_s13 = sshll.u32 %s1222_s14, 4  ;;  %s1227_s16 = int_to_ptr.vmem [resolvable:$true] %s604_s16  ;;  %s1237_s13 = int_to_ptr.vmem [resolvable:$true] %s625_s13 }
  0x35   : > { %454 = vmatpush1.bf16.msra.mxu0 %v416_v8  ;;  %536 = vmatpush1.bf16.msra.mxu1 %v416_v8  ;;  %v491_v14 = vld [vmem:[%s1326_s4] sm:$0xff]  ;;  %v492_v18 = vld [vmem:[%s1326_s4 + $0x8] sm:$0xff]  ;;  %s1234_s9 = scalar_lea.hbm %s1327_s5, %s841_s7  ;;  %s949_s20 = scalar_lea.vmem %s1227_s16, 512 }
  0x36   : > { %455 = vmatprep.subr.bf16.mxu0 %v415_v9  ;;  %537 = vmatprep.subr.bf16.mxu1 %v415_v9  ;;  %v918_v15 = vld [vmem:[%s1323_s1] sm:$0xff]   ;;  %v920_v20 = vld [vmem:[%s1324_s2 + $0x8] ss:$0 sps:$4 sm:$0xff]   ;;  %p950_p8 = scmp.ne.s32.totalorder %s1227_s16, %s949_s20  ;;  %s1065_s27 = smov [#allocation5]  }
  0x37   : > { %424 = vperm.xlu0 %916, %v420_v13   ;;  %v919_v16 = vld [vmem:[%s1324_s2] sm:$0xff]   ;;  %496 = vperm.xlu1 %917, %v491_v14   ;;  %s953_s28 = sshll.u32 %s1065_s27, 4  ;;  %s954_s28 = int_to_ptr.vmem [resolvable:$false] %s953_s28 }
  0x38   : > { %p951_p12 = pnand %p950_p8, %p1155_p9  ;;  %s955_s7 = scalar_lea.vmem %s954_s28, 1024 }
  0x39   : > { %456 = vmatpush1.bf16.msra.mxu0 %v414_v12  ;;  %538 = vmatpush1.bf16.msra.mxu1 %v414_v12  ;;  %p956_p1 = scmp.lt.s32.totalorder %s1227_s16, %s954_s28  ;;  %p957_p3 = scmp.lt.s32.totalorder %s955_s7, %s949_s20 }
  0x3a   : > { %p952_p0 = pneg %p951_p12 }
  0x3b   : > { %429 = vperm.xlu0 %916, %v421_v17   ;;  %501 = vperm.xlu1 %917, %v492_v18   ;;  %p958_p5 = por %p957_p3, %p956_p1 }
  0x3c   : > { %829 = vmatmul.mubr.msk.bf16.vlgmr.msra.gmra.mxu0 %vm437_vm0, %v918_v15  ;;  %832 = vmatmul.mubr.msk.bf16.vlgmr.msra.gmra.mxu1 %vm437_vm0, %v919_v16 }
  0x3d   : > { %565 = vmatprep.mubr.bf16.mxu1 %v1064_v0  ;;  %p959_p6 = pnand %p958_p5, %p952_p0 }
  0x3f   : > { %506 = vperm.xlu0 %916, %v493_v19  }
  0x44   : > { %833 = vmatmul.mubr.msk.bf16.gmra.mxu1 %vm437_vm0, %v920_v20 }
  0xb2   : > { %v425_v21 = vpop.permute.xlu0 %424  ;;  %v497_v22 = vpop.permute.xlu1 %496 }
  0xb6   : > { %v430_v25 = vpop.permute.xlu0 %429  ;;  %v502_v28 = vpop.permute.xlu1 %501 }
  0xba   : > { %v507_v41 = vpop.permute.xlu0 %506 }
  0xfc   : > { %v475_v23 = vpop.f32.mrf.mxu0  ;;  %v557_v24 = vpop.f32.mrf.mxu1 }
  0xfd   : > { %v476_v26 = vadd.f32 %v475_v23, %v425_v21  ;;  %v558_v27 = vadd.f32 %v557_v24, %v497_v22 }
  0xfe   : > { %v477_v29 = vpop.f32.mrf.mxu0  ;;  %v559_v30 = vpop.f32.mrf.mxu1 }
  0xff   : > { %484 = vst [vmem:[%s368_s8] sm:$0xff] %v476_v26  ;;  %574 = vst [vmem:[%s1222_s14] sm:$0xff] %v558_v27  ;;  %v478_v31 = vadd.f32 %v477_v29, %v425_v21  ;;  %v560_v32 = vadd.f32 %v559_v30, %v497_v22 }
 0x100   : > { %v479_v33 = vpop.f32.mrf.mxu0  ;;  %v561_v34 = vpop.f32.mrf.mxu1 }
 0x101   : > { %485 = vst [vmem:[%s368_s8 + $0x8] sm:$0xff] %v478_v31  ;;  %575 = vst [vmem:[%s1222_s14 + $0x8] sm:$0xff] %v560_v32  ;;  %v480_v35 = vadd.f32 %v479_v33, %v430_v25  ;;  %v562_v36 = vadd.f32 %v561_v34, %v502_v28 }
 0x102   : > { %v481_v37 = vpop.f32.mrf.mxu0  ;;  %v563_v38 = vpop.f32.mrf.mxu1 }
 0x103   : > { %486 = vst [vmem:[%s368_s8 + $0x10] sm:$0xff] %v480_v35  ;;  %576 = vst [vmem:[%s1222_s14 + $0x10] sm:$0xff] %v562_v36  ;;  %v482_v39 = vadd.f32 %v481_v37, %v430_v25  ;;  %v564_v40 = vadd.f32 %v563_v38, %v502_v28 }
 0x104   : > { %v567_v42 = vpop.f32.mrf.mxu1 }
 0x105   : > { %487 = vst [vmem:[%s368_s8 + $0x18] sm:$0xff] %v482_v39  ;;  %577 = vst [vmem:[%s1222_s14 + $0x18] sm:$0xff] %v564_v40  ;;  %v568_v43 = vadd.f32 %v567_v42, %v507_v41 }
 0x106   : > { %v569_v44 = vpop.f32.mrf.mxu1 }
 0x107   : > { %962 = shalt.err (!%p959_p6)
}
 0x108   : > { %s963_s8 = scalar_lea.hbm %s1234_s9, 512  ;;  %s967_s27 = scalar_lea.hbm %s1327_s5, 1024 }
 0x109   : > { %p964_p7 = scmp.ne.s32.totalorder %s1234_s9, %s963_s8  ;;  %p968_p13 = scmp.lt.s32.totalorder %s1234_s9, %s1327_s5 }
 0x10a   : > { %p969_p2 = scmp.lt.s32.totalorder %s967_s27, %s963_s8 }
 0x10b   : > { %p965_p10 = pnand %p964_p7, %p1155_p9 }
 0x10c   : > { %p970_p8 = por %p969_p2, %p968_p13 }
 0x10d   : > { %p966_p4 = pneg %p965_p10 }
 0x10f   : > { %p971_p12 = pnand %p970_p8, %p966_p4 }
 0x111   : > { %974 = shalt.err (!%p971_p12)
}
 0x112   : > { %s1066_s20 = smov 256   ;;  %s1067_s28 = smov 16   ;;  %578 = vst [vmem:[%s1222_s14 + $0x20] sm:$0xff] %v568_v43  ;;  %v570_v45 = vadd.f32 %v569_v44, %v507_v41  ;;  %v571_v46 = vpop.f32.mrf.mxu1 }
 0x113   : > { %s1336_s17 = scalar_lea.sflag [#allocation4], %s1188_s15  ;;  %s1337_s18 = smul.u32 768, %s1051_s24 }
 0x114   : > { %846 = dma.vmem_to_hbm [thread:$0]  (%p1155_p9), %s1227_s16, 512, %s1234_s9, %s1336_s17, %s1066_s20, %s1066_s20, %s1067_s28   ;;  %v572_v47 = vpop.f32.mrf.mxu1 }
 0x115   : > { %s1272_s19 = scalar_lea.hbm %s1328_s6, %s1337_s18  ;;  %579 = vst [vmem:[%s1222_s14 + $0x28] sm:$0xff] %v570_v45  ;;  %s586_s30 = scalar_lea.sflag [#allocation7], %s1188_s15 }
 0x116   : > { %s975_s27 = scalar_lea.vmem %s1237_s13, 768  ;;  %s1068_s0 = smov [#allocation6]  }
 0x117   : > { %p976_p0 = scmp.ne.s32.totalorder %s1237_s13, %s975_s27  ;;  %s979_s16 = sshll.u32 %s1068_s0, 4  ;;  %s980_s16 = int_to_ptr.vmem [resolvable:$false] %s979_s16 }
 0x118   : > { %s981_s9 = scalar_lea.vmem %s980_s16, 1536  ;;  %p982_p5 = scmp.lt.s32.totalorder %s1237_s13, %s980_s16 }
 0x119   : > { %p977_p1 = pnand %p976_p0, %p1155_p9  ;;  %p983_p6 = scmp.lt.s32.totalorder %s981_s9, %s975_s27 }
 0x11b   : > { %p978_p3 = pneg %p977_p1  ;;  %p984_p7 = por %p983_p6, %p982_p5 }
 0x11d   : > { %p985_p10 = pnand %p984_p7, %p978_p3 }
 0x11f   : > { %988 = shalt.err (!%p985_p10)
}
 0x120   : > { %s989_s24 = scalar_lea.hbm %s1272_s19, 768  ;;  %s993_s0 = scalar_lea.hbm %s1328_s6, 1536 }
 0x121   : > { %p990_p4 = scmp.ne.s32.totalorder %s1272_s19, %s989_s24  ;;  %p994_p8 = scmp.lt.s32.totalorder %s1272_s19, %s1328_s6 }
 0x122   : > { %p995_p12 = scmp.lt.s32.totalorder %s993_s0, %s989_s24 }
 0x123   : > { %p991_p13 = pnand %p990_p4, %p1155_p9 }
 0x124   : > { %p996_p0 = por %p995_p12, %p994_p8 }
 0x125   : > { %p992_p2 = pneg %p991_p13 }
 0x127   : > { %p997_p1 = pnand %p996_p0, %p992_p2 }
 0x129   : > { %1000 = shalt.err (!%p997_p1)
}
 0x12a   : > { %847 = dma.vmem_to_hbm [thread:$0]  (%p1155_p9), %s1237_s13, 768, %s1272_s19, %s586_s30, %s1066_s20, %s1066_s20, %s1067_s28  }
 0x12b PF: > { %s640_s7 = sand.u32 1, %s1039_s21   ;;  %p1338_p3 = scmp.ge.s32.totalorder %s1059_s26, 2 }
 0x12c   : > { %s641_s8 = scalar_lea.sflag [#allocation4], %s640_s7 }
 0x12d   : > { %p855_p5 = pnand %p1338_p3, %p1162_p11 }
 0x12f   : > { %p856_p6 = pneg %p855_p5 }
 0x131   : > { %1030 = dma.done.wait (%p856_p6), %s641_s8, 512  }
 0x132   : > { %1032 = vsyncadd (%p856_p6), %s641_s8, 4294966784  ;;  %s650_s27 = scalar_lea.sflag [#allocation7], %s640_s7 }
 0x133   : > { %1034 = dma.done.wait (%p856_p6), %s650_s27, 768  }
 0x134   : > { %1036 = vsyncadd (%p856_p6), %s650_s27, 4294966528  ;;  %s26_s26 = sadd.s32 1, %s1059_s26   ;;  %s1339_s21 = smov %s1043_s22 }
 0x135   : > { %p23_p7 = scmp.ge.s32.totalorder %s26_s26, 4   ;;  %s1340_s22 = smov %s1047_s23 }
 0x136   : > { %s1341_s23 = smov %s1160_s11  ;;  %s1342_s24 = smov %s1055_s25 }
 0x137   : > { %s1343_s25 = smov %s1345_s29  ;;  %25 = sbr.rel (!%p23_p7) target bundleno = 10 (0xa), region = 114 }
 0x13c   :  { %655 = vsyncpa [#allocation3], 1 }
 0x13d   :  { %657 = vsyncpa [#allocation3 + $0x1], 1 }
 0x13e   :  { %658 = vsyncpa [#allocation4], 1 }
 0x13f   :  { %660 = vsyncpa [#allocation4 + $0x1], 1 }
 0x140   :  { %661 = vsyncpa [#allocation7], 1 }
 0x141   :  { %663 = vsyncpa [#allocation7 + $0x1], 1 }

</bundles_post_ra>
